<compile_context>
chip_gen: v7x
topology: tpu7x:2x2x1
jax: 0.10.0
libtpu: 0.0.40
codegen_flags: <defaults>
</compile_context>

<pallas_src>
import math
import numpy as np
import jax
import jax.numpy as jnp
from jax import lax
from jax.experimental import pallas as pl
from jax.experimental.pallas import tpu as pltpu


def bert_embed_kernel(seq_ids_ref, seg_ids_ref,   # scalar-prefetch (SMEM)
                      tok_tab_ref, seg_tab_ref,   # VMEM-resident tables
                      pe_ref, out_ref):           # (TS, E_pad) tiles
    """One (TS, E_pad) row tile: gather token+segment rows, add positional."""
    ts, _ = out_ref.shape                         # static Python ints
    b = pl.program_id(0)
    t = pl.program_id(1)
    n_t = pl.num_programs(1)
    base = (b * n_t + t) * ts                     # flat row offset into (B*S)

    def gather_row(r, carry):
        tid = seq_ids_ref[base + r]               # scalar SMEM reads
        sid = seg_ids_ref[base + r]
        out_ref[pl.ds(r, 1), :] = (tok_tab_ref[pl.ds(tid, 1), :]
                                   + seg_tab_ref[pl.ds(sid, 1), :])
        return carry

    if ts <= 32:                                  # small tile: plain unroll
        for r in range(ts):
            gather_row(r, 0)
    else:
        lax.fori_loop(0, ts, gather_row, 0)

    # Positional embedding: single vectorized add over the lane-dense tile.
    out_ref[...] = out_ref[...] + pe_ref[...]
    # TODO(synk): training-mode dropout omitted; eval-mode nn.Dropout == identity.


def bert_embedding(sequence, segment_label, token_table, segment_table, pe):
    B, S = sequence.shape
    V, E = token_table.shape
    assert pe.shape == (S, E)

    E_pad = ((E + 127) // 128) * 128              # lane-dense last dim
    TS = S if S <= 256 else 256                   # rows per tile
    assert S % TS == 0 and (TS % 8 == 0 or TS == S), "seq tile must be 8-aligned"
    n_t = S // TS

    def pad2d(x, rows, cols):
        return jnp.pad(x.astype(jnp.float32),
                       ((0, rows - x.shape[0]), (0, cols - x.shape[1])))

    nseg = max(8, segment_table.shape[0])         # pad segment rows to 8
    tok_p = pad2d(token_table, V, E_pad)
    seg_p = pad2d(segment_table, nseg, E_pad)
    pe_p = pad2d(pe, S, E_pad)

    seq_flat = sequence.reshape(-1).astype(jnp.int32)
    seg_flat = segment_label.reshape(-1).astype(jnp.int32)

    grid_spec = pltpu.PrefetchScalarGridSpec(
        num_scalar_prefetch=2,
        grid=(B, n_t),
        in_specs=[
            pl.BlockSpec(memory_space=pltpu.MemorySpace.VMEM),   # token table
            pl.BlockSpec(memory_space=pltpu.MemorySpace.VMEM),   # segment table
            pl.BlockSpec((TS, E_pad), lambda b, t, seq, seg: (t, 0)),   # pe tile
        ],
        out_specs=pl.BlockSpec((TS, E_pad),
                               lambda b, t, seq, seg: (b * n_t + t, 0)),
    )

    # Tables + double-buffered pe/out tiles, plus slack; raise above the v5e
    # 16 MiB scoped default but stay well under every chip's physical VMEM.
    need = 4 * (V * E_pad + nseg * E_pad + 4 * TS * E_pad) + (1 << 20)
    vmem_limit = int(max(2 * need, 16 * 2 ** 20))

    out_flat = pl.pallas_call(
        bert_embed_kernel,
        out_shape=jax.ShapeDtypeStruct((B * S, E_pad), jnp.float32),
        grid_spec=grid_spec,
        compiler_params=pltpu.CompilerParams(
            dimension_semantics=("parallel", "parallel"),
            vmem_limit_bytes=vmem_limit,
        ),
    )(seq_flat, seg_flat, tok_p, seg_p, pe_p)

    return out_flat[:, :E].reshape(B, S, E)


def make_positional_table(d_in, max_len):
    # Exact replication of the PyTorch double loop (note: it uses 2*i, not i).
    pe = np.zeros((max_len, d_in), dtype=np.float32)
    for pos in range(max_len):
        for i in range(0, d_in, 2):
            pe[pos, i] = math.sin(pos / 10000 ** (2 * i / d_in))
            pe[pos, i + 1] = math.cos(pos / 10000 ** (2 * (i + 1) / d_in))
    return jnp.asarray(pe)


if __name__ == "__main__":
    vocab_size, embed_size, seq_len, batch = 64, 32, 8, 2

    key = jax.random.PRNGKey(0)
    k_tok, k_seg, k_ids, k_segids = jax.random.split(key, 4)

    # nn.Embedding init ~ N(0, 1); padding_idx=0 row is zero.
    token_table = jax.random.normal(k_tok, (vocab_size, embed_size), jnp.float32)
    token_table = token_table.at[0].set(0.0)
    segment_table = jax.random.normal(k_seg, (3, embed_size), jnp.float32)
    segment_table = segment_table.at[0].set(0.0)

    pe = make_positional_table(embed_size, seq_len)          # (S, E)

    sequence = jax.random.randint(k_ids, (batch, seq_len), 0, vocab_size, jnp.int32)
    segment_label = jax.random.randint(k_segids, (batch, seq_len), 0, 3, jnp.int32)

    out = bert_embedding(sequence, segment_label, token_table, segment_table, pe)
    out = jax.block_until_ready(out)

    # Pure-JAX reference check.
    ref = (jnp.take(token_table, sequence, axis=0)
           + jnp.take(segment_table, segment_label, axis=0)
           + pe[None, :, :])
    np.testing.assert_allclose(np.asarray(out), np.asarray(ref), rtol=1e-6, atol=1e-6)

    print("KERNEL_OK")
</pallas_src>

<mosaic_0001>
module attributes {stable_mosaic.version = 11 : i64} {
  func.func @bert_embed_kernel(%arg0: i32, %arg1: i32, %arg2: memref<16xi32, #tpu.memory_space<smem>>, %arg3: memref<16xi32, #tpu.memory_space<smem>>, %arg4: memref<64x128xf32, #tpu.memory_space<vmem>>, %arg5: memref<8x128xf32, #tpu.memory_space<vmem>>, %arg6: memref<8x128xf32, #tpu.memory_space<vmem>>, %arg7: memref<8x128xf32, #tpu.memory_space<vmem>>) attributes {dimension_semantics = [#tpu.dimension_semantics<parallel>, #tpu.dimension_semantics<parallel>], iteration_bounds = array<i64: 2, 1>, scalar_prefetch = 2 : i64, scratch_operands = 0 : i64, tpu.core_type = #tpu.core_type<tc>, window_params = [{pipeline_mode = #tpu.pipeline_mode<synchronous>, transform_indices = @transform_0, window_bounds = array<i64: 64, 128>}, {pipeline_mode = #tpu.pipeline_mode<synchronous>, transform_indices = @transform_1, window_bounds = array<i64: 8, 128>}, {transform_indices = @transform_2, window_bounds = array<i64: 8, 128>}, {transform_indices = @transform_3, window_bounds = array<i64: 8, 128>}]} {
    %c1_i32 = arith.constant 1 : i32
    %0 = arith.muli %arg0, %c1_i32 : i32
    %1 = arith.addi %0, %arg1 : i32
    %c8_i32 = arith.constant 8 : i32
    %2 = arith.muli %1, %c8_i32 : i32
    %c0_i32 = arith.constant 0 : i32
    %3 = arith.addi %2, %c0_i32 : i32
    %4 = arith.index_cast %3 : i32 to index
    %5 = memref.load %arg2[%4] : memref<16xi32, #tpu.memory_space<smem>>
    %c0_i32_0 = arith.constant 0 : i32
    %6 = arith.addi %2, %c0_i32_0 : i32
    %7 = arith.index_cast %6 : i32 to index
    %8 = memref.load %arg3[%7] : memref<16xi32, #tpu.memory_space<smem>>
    %9 = arith.index_cast %5 : i32 to index
    %c0 = arith.constant 0 : index
    %10 = vector.load %arg4[%9, %c0] : memref<64x128xf32, #tpu.memory_space<vmem>>, vector<1x128xf32>
    %11 = arith.index_cast %8 : i32 to index
    %c0_1 = arith.constant 0 : index
    %12 = vector.load %arg5[%11, %c0_1] : memref<8x128xf32, #tpu.memory_space<vmem>>, vector<1x128xf32>
    %13 = arith.addf %10, %12 : vector<1x128xf32>
    %c0_2 = arith.constant 0 : index
    %c0_3 = arith.constant 0 : index
    %14 = vector.load %arg7[%c0_2, %c0_3] : memref<8x128xf32, #tpu.memory_space<vmem>>, vector<1x128xf32>
    tpu.vector_store %arg7[%c0_2, %c0_3], %13 {strides = array<i32>} : memref<8x128xf32, #tpu.memory_space<vmem>>, vector<1x128xf32>,
    %c1_i32_4 = arith.constant 1 : i32
    %15 = arith.addi %2, %c1_i32_4 : i32
    %16 = arith.index_cast %15 : i32 to index
    %17 = memref.load %arg2[%16] : memref<16xi32, #tpu.memory_space<smem>>
    %c1_i32_5 = arith.constant 1 : i32
    %18 = arith.addi %2, %c1_i32_5 : i32
    %19 = arith.index_cast %18 : i32 to index
    %20 = memref.load %arg3[%19] : memref<16xi32, #tpu.memory_space<smem>>
    %21 = arith.index_cast %17 : i32 to index
    %c0_6 = arith.constant 0 : index
    %22 = vector.load %arg4[%21, %c0_6] : memref<64x128xf32, #tpu.memory_space<vmem>>, vector<1x128xf32>
    %23 = arith.index_cast %20 : i32 to index
    %c0_7 = arith.constant 0 : index
    %24 = vector.load %arg5[%23, %c0_7] : memref<8x128xf32, #tpu.memory_space<vmem>>, vector<1x128xf32>
    %25 = arith.addf %22, %24 : vector<1x128xf32>
    %c1 = arith.constant 1 : index
    %c0_8 = arith.constant 0 : index
    %26 = vector.load %arg7[%c1, %c0_8] : memref<8x128xf32, #tpu.memory_space<vmem>>, vector<1x128xf32>
    tpu.vector_store %arg7[%c1, %c0_8], %25 {strides = array<i32>} : memref<8x128xf32, #tpu.memory_space<vmem>>, vector<1x128xf32>,
    %c2_i32 = arith.constant 2 : i32
    %27 = arith.addi %2, %c2_i32 : i32
    %28 = arith.index_cast %27 : i32 to index
    %29 = memref.load %arg2[%28] : memref<16xi32, #tpu.memory_space<smem>>
    %c2_i32_9 = arith.constant 2 : i32
    %30 = arith.addi %2, %c2_i32_9 : i32
    %31 = arith.index_cast %30 : i32 to index
    %32 = memref.load %arg3[%31] : memref<16xi32, #tpu.memory_space<smem>>
    %33 = arith.index_cast %29 : i32 to index
    %c0_10 = arith.constant 0 : index
    %34 = vector.load %arg4[%33, %c0_10] : memref<64x128xf32, #tpu.memory_space<vmem>>, vector<1x128xf32>
    %35 = arith.index_cast %32 : i32 to index
    %c0_11 = arith.constant 0 : index
    %36 = vector.load %arg5[%35, %c0_11] : memref<8x128xf32, #tpu.memory_space<vmem>>, vector<1x128xf32>
    %37 = arith.addf %34, %36 : vector<1x128xf32>
    %c2 = arith.constant 2 : index
    %c0_12 = arith.constant 0 : index
    %38 = vector.load %arg7[%c2, %c0_12] : memref<8x128xf32, #tpu.memory_space<vmem>>, vector<1x128xf32>
    tpu.vector_store %arg7[%c2, %c0_12], %37 {strides = array<i32>} : memref<8x128xf32, #tpu.memory_space<vmem>>, vector<1x128xf32>,
    %c3_i32 = arith.constant 3 : i32
    %39 = arith.addi %2, %c3_i32 : i32
    %40 = arith.index_cast %39 : i32 to index
    %41 = memref.load %arg2[%40] : memref<16xi32, #tpu.memory_space<smem>>
    %c3_i32_13 = arith.constant 3 : i32
    %42 = arith.addi %2, %c3_i32_13 : i32
    %43 = arith.index_cast %42 : i32 to index
    %44 = memref.load %arg3[%43] : memref<16xi32, #tpu.memory_space<smem>>
    %45 = arith.index_cast %41 : i32 to index
    %c0_14 = arith.constant 0 : index
    %46 = vector.load %arg4[%45, %c0_14] : memref<64x128xf32, #tpu.memory_space<vmem>>, vector<1x128xf32>
    %47 = arith.index_cast %44 : i32 to index
    %c0_15 = arith.constant 0 : index
    %48 = vector.load %arg5[%47, %c0_15] : memref<8x128xf32, #tpu.memory_space<vmem>>, vector<1x128xf32>
    %49 = arith.addf %46, %48 : vector<1x128xf32>
    %c3 = arith.constant 3 : index
    %c0_16 = arith.constant 0 : index
    %50 = vector.load %arg7[%c3, %c0_16] : memref<8x128xf32, #tpu.memory_space<vmem>>, vector<1x128xf32>
    tpu.vector_store %arg7[%c3, %c0_16], %49 {strides = array<i32>} : memref<8x128xf32, #tpu.memory_space<vmem>>, vector<1x128xf32>,
    %c4_i32 = arith.constant 4 : i32
    %51 = arith.addi %2, %c4_i32 : i32
    %52 = arith.index_cast %51 : i32 to index
    %53 = memref.load %arg2[%52] : memref<16xi32, #tpu.memory_space<smem>>
    %c4_i32_17 = arith.constant 4 : i32
    %54 = arith.addi %2, %c4_i32_17 : i32
    %55 = arith.index_cast %54 : i32 to index
    %56 = memref.load %arg3[%55] : memref<16xi32, #tpu.memory_space<smem>>
    %57 = arith.index_cast %53 : i32 to index
    %c0_18 = arith.constant 0 : index
    %58 = vector.load %arg4[%57, %c0_18] : memref<64x128xf32, #tpu.memory_space<vmem>>, vector<1x128xf32>
    %59 = arith.index_cast %56 : i32 to index
    %c0_19 = arith.constant 0 : index
    %60 = vector.load %arg5[%59, %c0_19] : memref<8x128xf32, #tpu.memory_space<vmem>>, vector<1x128xf32>
    %61 = arith.addf %58, %60 : vector<1x128xf32>
    %c4 = arith.constant 4 : index
    %c0_20 = arith.constant 0 : index
    %62 = vector.load %arg7[%c4, %c0_20] : memref<8x128xf32, #tpu.memory_space<vmem>>, vector<1x128xf32>
    tpu.vector_store %arg7[%c4, %c0_20], %61 {strides = array<i32>} : memref<8x128xf32, #tpu.memory_space<vmem>>, vector<1x128xf32>,
    %c5_i32 = arith.constant 5 : i32
    %63 = arith.addi %2, %c5_i32 : i32
    %64 = arith.index_cast %63 : i32 to index
    %65 = memref.load %arg2[%64] : memref<16xi32, #tpu.memory_space<smem>>
    %c5_i32_21 = arith.constant 5 : i32
    %66 = arith.addi %2, %c5_i32_21 : i32
    %67 = arith.index_cast %66 : i32 to index
    %68 = memref.load %arg3[%67] : memref<16xi32, #tpu.memory_space<smem>>
    %69 = arith.index_cast %65 : i32 to index
    %c0_22 = arith.constant 0 : index
    %70 = vector.load %arg4[%69, %c0_22] : memref<64x128xf32, #tpu.memory_space<vmem>>, vector<1x128xf32>
    %71 = arith.index_cast %68 : i32 to index
    %c0_23 = arith.constant 0 : index
    %72 = vector.load %arg5[%71, %c0_23] : memref<8x128xf32, #tpu.memory_space<vmem>>, vector<1x128xf32>
    %73 = arith.addf %70, %72 : vector<1x128xf32>
    %c5 = arith.constant 5 : index
    %c0_24 = arith.constant 0 : index
    %74 = vector.load %arg7[%c5, %c0_24] : memref<8x128xf32, #tpu.memory_space<vmem>>, vector<1x128xf32>
    tpu.vector_store %arg7[%c5, %c0_24], %73 {strides = array<i32>} : memref<8x128xf32, #tpu.memory_space<vmem>>, vector<1x128xf32>,
    %c6_i32 = arith.constant 6 : i32
    %75 = arith.addi %2, %c6_i32 : i32
    %76 = arith.index_cast %75 : i32 to index
    %77 = memref.load %arg2[%76] : memref<16xi32, #tpu.memory_space<smem>>
    %c6_i32_25 = arith.constant 6 : i32
    %78 = arith.addi %2, %c6_i32_25 : i32
    %79 = arith.index_cast %78 : i32 to index
    %80 = memref.load %arg3[%79] : memref<16xi32, #tpu.memory_space<smem>>
    %81 = arith.index_cast %77 : i32 to index
    %c0_26 = arith.constant 0 : index
    %82 = vector.load %arg4[%81, %c0_26] : memref<64x128xf32, #tpu.memory_space<vmem>>, vector<1x128xf32>
    %83 = arith.index_cast %80 : i32 to index
    %c0_27 = arith.constant 0 : index
    %84 = vector.load %arg5[%83, %c0_27] : memref<8x128xf32, #tpu.memory_space<vmem>>, vector<1x128xf32>
    %85 = arith.addf %82, %84 : vector<1x128xf32>
    %c6 = arith.constant 6 : index
    %c0_28 = arith.constant 0 : index
    %86 = vector.load %arg7[%c6, %c0_28] : memref<8x128xf32, #tpu.memory_space<vmem>>, vector<1x128xf32>
    tpu.vector_store %arg7[%c6, %c0_28], %85 {strides = array<i32>} : memref<8x128xf32, #tpu.memory_space<vmem>>, vector<1x128xf32>,
    %c7_i32 = arith.constant 7 : i32
    %87 = arith.addi %2, %c7_i32 : i32
    %88 = arith.index_cast %87 : i32 to index
    %89 = memref.load %arg2[%88] : memref<16xi32, #tpu.memory_space<smem>>
    %c7_i32_29 = arith.constant 7 : i32
    %90 = arith.addi %2, %c7_i32_29 : i32
    %91 = arith.index_cast %90 : i32 to index
    %92 = memref.load %arg3[%91] : memref<16xi32, #tpu.memory_space<smem>>
    %93 = arith.index_cast %89 : i32 to index
    %c0_30 = arith.constant 0 : index
    %94 = vector.load %arg4[%93, %c0_30] : memref<64x128xf32, #tpu.memory_space<vmem>>, vector<1x128xf32>
    %95 = arith.index_cast %92 : i32 to index
    %c0_31 = arith.constant 0 : index
    %96 = vector.load %arg5[%95, %c0_31] : memref<8x128xf32, #tpu.memory_space<vmem>>, vector<1x128xf32>
    %97 = arith.addf %94, %96 : vector<1x128xf32>
    %c7 = arith.constant 7 : index
    %c0_32 = arith.constant 0 : index
    %98 = vector.load %arg7[%c7, %c0_32] : memref<8x128xf32, #tpu.memory_space<vmem>>, vector<1x128xf32>
    tpu.vector_store %arg7[%c7, %c0_32], %97 {strides = array<i32>} : memref<8x128xf32, #tpu.memory_space<vmem>>, vector<1x128xf32>,
    %c0_33 = arith.constant 0 : index
    %c0_34 = arith.constant 0 : index
    %99 = vector.load %arg7[%c0_33, %c0_34] : memref<8x128xf32, #tpu.memory_space<vmem>>, vector<8x128xf32>
    %c0_35 = arith.constant 0 : index
    %c0_36 = arith.constant 0 : index
    %100 = vector.load %arg6[%c0_35, %c0_36] : memref<8x128xf32, #tpu.memory_space<vmem>>, vector<8x128xf32>
    %101 = arith.addf %99, %100 : vector<8x128xf32>
    %c0_37 = arith.constant 0 : index
    %c0_38 = arith.constant 0 : index
    %102 = vector.load %arg7[%c0_37, %c0_38] : memref<8x128xf32, #tpu.memory_space<vmem>>, vector<8x128xf32>
    tpu.vector_store %arg7[%c0_37, %c0_38], %101 {strides = array<i32>} : memref<8x128xf32, #tpu.memory_space<vmem>>, vector<8x128xf32>,
    return
  }
  func.func @transform_0(%arg0: i32, %arg1: i32, %arg2: memref<16xi32, #tpu.memory_space<smem>>, %arg3: memref<16xi32, #tpu.memory_space<smem>>) -> (i32, i32) {
    %c0_i32 = arith.constant 0 : i32
    %c0_i32_0 = arith.constant 0 : i32
    %c0_i32_1 = arith.constant 0 : i32
    return %c0_i32, %c0_i32_0 : i32, i32
  }
  func.func @transform_1(%arg0: i32, %arg1: i32, %arg2: memref<16xi32, #tpu.memory_space<smem>>, %arg3: memref<16xi32, #tpu.memory_space<smem>>) -> (i32, i32) {
    %c0_i32 = arith.constant 0 : i32
    %c0_i32_0 = arith.constant 0 : i32
    %c0_i32_1 = arith.constant 0 : i32
    return %c0_i32, %c0_i32_0 : i32, i32
  }
  func.func @transform_2(%arg0: i32, %arg1: i32, %arg2: memref<16xi32, #tpu.memory_space<smem>>, %arg3: memref<16xi32, #tpu.memory_space<smem>>) -> (i32, i32) {
    %c0_i32 = arith.constant 0 : i32
    %c0_i32_0 = arith.constant 0 : i32
    return %arg1, %c0_i32 : i32, i32
  }
  func.func @transform_3(%arg0: i32, %arg1: i32, %arg2: memref<16xi32, #tpu.memory_space<smem>>, %arg3: memref<16xi32, #tpu.memory_space<smem>>) -> (i32, i32) {
    %c1_i32 = arith.constant 1 : i32
    %0 = arith.muli %arg0, %c1_i32 : i32
    %1 = arith.addi %0, %arg1 : i32
    %c0_i32 = arith.constant 0 : i32
    %c0_i32_0 = arith.constant 0 : i32
    return %1, %c0_i32 : i32, i32
  }
}

</mosaic_0001>

<bundles_post_ra>
// kernel: tpu_custom_call.1
= control target key start
LH: loop header
LB: loop body
LE: loop exit
PB: predicated region body
PF: predicated region fallthrough
CT: control target
= control target key end

     0   :  { %s946_s0 = inlined_call_operand.hbm [shape: s32[16], index: 0, kind: input, shape index: {}]   ;;  %s947_s2 = inlined_call_operand.hbm [shape: f32[64,128], index: 2, kind: input, shape index: {}]   ;;  %s948_s3 = inlined_call_operand.vmem [shape: f32[8,128], index: 3, kind: input, shape index: {}]   ;;  %s949_s4 = inlined_call_operand.hbm [shape: f32[8,128], index: 4, kind: input, shape index: {}]   ;;  %s950_s5 = inlined_call_operand.hbm [shape: f32[16,128], index: 5, kind: output, shape index: {}]   ;;  %s951_s1 = inlined_call_operand.vmem [shape: s32[16], index: 1, kind: input, shape index: {}]  }
   0x1   :  { %960 = sst [smem:[#allocation19_spill]] %s947_s2  ;;  %s491_s20 = scalar_lea.hbm %s946_s0, 16 }
   0x2   :  { %961 = sst [smem:[#allocation20_spill]] %s949_s4  ;;  %p492_p0 = scmp.ne.s32.totalorder %s946_s0, %s491_s20 }
   0x3   :  { %p495_p1 = scmp.lt.u32.totalorder %s491_s20, %s946_s0 }
   0x5   :  { %p497_p2 = pnand %p495_p1, %p492_p0 }
   0x7   :  { %500 = shalt.err (!%p497_p2)  }
   0x8   :  { %s659_s25 = smov [#allocation3]   ;;  %s12_s30 = sshll.u32 %s951_s1, 4  ;;  %s13_s30 = int_to_ptr.vmem [resolvable:$true] %s12_s30 }
   0x9   :  { %11 = dma.hbm_to_smem %s946_s0, 16, %s659_s25, [#allocation2] }
   0xa   :  { %s501_s6 = scalar_lea.vmem %s13_s30, 16  ;;  %p506_p4 = scmp.lt.s32.totalorder %s13_s30, %s13_s30 }
   0xb   :  { %p502_p3 = scmp.ne.s32.totalorder %s13_s30, %s501_s6  ;;  %p507_p5 = scmp.lt.s32.totalorder %s501_s6, %s501_s6 }
   0xd   :  { %p508_p6 = por %p507_p5, %p506_p4 }
   0xf   :  { %p509_p7 = pnand %p508_p6, %p502_p3 }
  0x11   :  { %512 = shalt.err (!%p509_p7)  }
  0x12   :  { %s660_s7 = smov [#allocation4]  }
  0x13   :  { %15 = dma.vmem_to_smem %s13_s30, 16, %s660_s7, [#allocation2] }
  0x14   :  { %621 = dma.done.wait [#allocation2], 32 }
  0x15   :  { %622 = vsyncadd [#allocation2], 4294967264 }
  0x16   :  { %17 = sfence }
  0x17   :  { %18 = vsyncpa [#allocation6], 0 }
  0x18   :  { %19 = vsyncpa [#allocation9], 0 }
  0x19   :  { %20 = vsyncpa [#allocation7], 0 }
  0x1a   :  { %22 = vsyncpa [#allocation7 + $0x1], 0  ;;  %s711_s0 = smov 0   ;;  %s713_s1 = smov 0  }
  0x1b   :  { %s715_s8 = smov 0   ;;  %s717_s9 = smov 0  }
  0x1c   :  { %s719_s10 = smov 0   ;;  %s721_s11 = smov 0  }
  0x1d LB: > { %962 = sst [smem:[#allocation15_spill]] %s645_s8  ;;  %s397_s12 = sadd.s32 4294967295, %s657_s11   ;;  %s657_s11 = sphi %s721_s11, %s28_s11   ;;  %s653_s10 = sphi %s719_s10, %s981_s10   ;;  %s649_s9 = sphi %s717_s9, %s980_s9   ;;  %s645_s8 = sphi %s715_s8, %s979_s8   ;;  %s641_s1 = sphi %s713_s1, %s983_s1   ;;  %s637_s0 = sphi %s711_s0, %s982_s0  }
  0x1e   : > { %963 = sst [smem:[#allocation16_spill]] %s653_s10  ;;  %s398_s13 = sadd.s32 4294967294, %s657_s11  }
  0x1f   : > { %s40_s14 = sadd.s32 1, %s653_s10  ;;  %s117_s15 = sadd.s32 1, %s645_s8 }
  0x20   : > { %p42_p8 = scmp.ge.s32.totalorder %s40_s14, 2  ;;  %p127_p9 = scmp.ne.s32.totalorder %s645_s8, %s641_s1 }
  0x21   : > { %p128_p10 = scmp.eq.s32.totalorder %s397_s12, 1  ;;  %p133_p11 = scmp.ne.s32.totalorder %s641_s1, %s637_s0 }
  0x22   : > { %s985_s14 = smov (%p42_p8, %s40_s14), 0  ;;  %p134_p13 = scmp.eq.s32.totalorder %s398_s13, 1 }
  0x23   : > { %964 = sst [smem:[#allocation17_spill]] %s985_s14  ;;  %p751_p12 = por %p128_p10, %p127_p9 }
  0x24   : > { %s114_s17 = ssub.s32 %s653_s10, %s985_s14  ;;  %p399_p0 = scmp.ge.s32.totalorder %s657_s11, 1 }
  0x25   : > { %s965_s16 = scalar_select %p751_p12, 1, 0 }
  0x26   : > { %p115_p1 = scmp.eq.s32.totalorder %s114_s17, 0  ;;  %p758_p2 = por %p134_p13, %p133_p11 }
  0x27   : > { %p141_p3 = scmp.lt.s32.totalorder %s657_s11, 3  ;;  %p770_p5 = scmp.eq.s32.totalorder %s397_s12, 0 }
  0x28   : > { %s966_s18 = scalar_select %p758_p2, 1, 0 }
  0x29   : > { %s764_s19 = scalar_select %p115_p1, %s645_s8, %s117_s15  }
  0x2a   : > { %p766_p4 = pnand %p399_p0, %p141_p3  ;;  %s661_s22 = smov [#allocation5]  }
  0x2b   : > { %967 = sst [smem:[#allocation18_spill]] %s764_s19  ;;  %s153_s23 = sshll.u32 %s661_s22, 4  ;;  %s154_s23 = int_to_ptr.vmem [resolvable:$true] %s153_s23 }
  0x2c   : > { %s968_s20 = scalar_select %p766_p4, 1, 0 }
  0x2d   : > { %s969_s21 = scalar_select %p770_p5, 1, 0 }
  0x2e   : > { %p421_p6 = pneg %p766_p4  ;;  %s662_s25 = smov [#allocation8]  }
  0x2f   : > { %s172_s26 = sshll.u32 %s662_s25, 4  ;;  %s971_s2 = sld [smem:[#allocation19_spill]]  ;;  %s782_s26 = int_to_ptr.vmem [resolvable:$true] %s172_s26 }
  0x30   : > { %p778_p7 = pnand %p770_p5, %p421_p6 }
  0x32   : > { %p515_p9 = pneg %p778_p7 }
  0x35   : > { %s513_s29 = scalar_lea.hbm %s971_s2, 1024 }
  0x36   : > { %p514_p8 = scmp.ne.s32.totalorder %s971_s2, %s513_s29  ;;  %p520_p13 = scmp.lt.u32.totalorder %s513_s29, %s971_s2 }
  0x38   : > { %p516_p10 = pnand %p515_p9, %p514_p8 }
  0x3a   : > { %p517_p11 = pneg %p516_p10 }
  0x3c   : > { %p522_p0 = pnand %p520_p13, %p517_p11 }
  0x3e   : > { %525 = shalt.err (!%p522_p0)
}
  0x3f   : > { %s526_s13 = scalar_lea.vmem %s154_s23, 1024  ;;  %p534_p2 = scmp.lt.s32.totalorder %s154_s23, %s154_s23 }
  0x40   : > { %p527_p1 = scmp.ne.s32.totalorder %s154_s23, %s526_s13  ;;  %p535_p12 = scmp.lt.s32.totalorder %s526_s13, %s526_s13 }
  0x42   : > { %p529_p3 = pnand %p527_p1, %p515_p9  ;;  %p536_p5 = por %p535_p12, %p534_p2 }
  0x44   : > { %p530_p6 = pneg %p529_p3 }
  0x46   : > { %p537_p4 = pnand %p536_p5, %p530_p6 }
  0x48   : > { %540 = shalt.err (!%p537_p4)
}
  0x49   : > { %s663_s15 = smov 128   ;;  %s664_s17 = smov 8  }
  0x4a   : > { %424 = dma.hbm_to_vmem [thread:$0]  (!%p778_p7), %s971_s2, 1024, %s154_s23, [#allocation6], %s663_s15, %s663_s15, %s664_s17  }
  0x4b   : > { %s972_s4 = sld [smem:[#allocation20_spill]] }
  0x51   : > { %s541_s29 = scalar_lea.hbm %s972_s4, 128 }
  0x52   : > { %p542_p8 = scmp.ne.s32.totalorder %s972_s4, %s541_s29  ;;  %p548_p4 = scmp.lt.u32.totalorder %s541_s29, %s972_s4 }
  0x54   : > { %p544_p12 = pnand %p542_p8, %p515_p9 }
  0x56   : > { %p545_p2 = pneg %p544_p12 }
  0x58   : > { %p550_p5 = pnand %p548_p4, %p545_p2 }
  0x5a   : > { %553 = shalt.err (!%p550_p5)
}
  0x5b   : > { %s554_s23 = scalar_lea.vmem %s782_s26, 128  ;;  %p562_p0 = scmp.lt.s32.totalorder %s782_s26, %s782_s26 }
  0x5c   : > { %p555_p10 = scmp.ne.s32.totalorder %s782_s26, %s554_s23  ;;  %p563_p1 = scmp.lt.s32.totalorder %s554_s23, %s554_s23 }
  0x5e   : > { %p557_p11 = pnand %p555_p10, %p515_p9  ;;  %p564_p3 = por %p563_p1, %p562_p0 }
  0x60   : > { %p558_p13 = pneg %p557_p11 }
  0x62   : > { %p565_p6 = pnand %p564_p3, %p558_p13 }
  0x64   : > { %568 = shalt.err (!%p565_p6)
}
  0x65   : > { %427 = dma.hbm_to_vmem [thread:$0]  (!%p778_p7), %s972_s4, 128, %s782_s26, [#allocation9]  }
  0x66   : > { %p973_p8 = scmp.ne.s32.totalorder %s968_s20, 0 }
  0x67   : > { %p974_p12 = scmp.ne.s32.totalorder (!%p973_p8), %s969_s21, 0 }
  0x68   : > { %185 = sbr.rel (%p973_p8) target bundleno = 167 (0xa7), region = 32 }
  0x6f   : > { %624 = dma.done.wait (%p974_p12), [#allocation6], 1024  }
  0x70   : > { %626 = vsyncadd (%p974_p12), [#allocation6], 4294966272 }
  0x71   : > { %628 = dma.done.wait (%p974_p12), [#allocation9], 128  }
  0x72   : > { %630 = vsyncadd (%p974_p12), [#allocation9], 4294967168  ;;  %s956_s24 = sand.u32 1, %s641_s1   ;;  %s843_s26 = sshll.u32 %s649_s9, 3  ;;  %v283_v24 = vld [vmem:[#allocation8] sm:$0xff] }
  0x73   : > { %s405_s20 = sshll.u32 %s956_s24, 3  ;;  %s211_s17 = sld [smem:[#allocation3 + %s843_s26]] }
  0x74   : > { %s212_s22 = sld [smem:[#allocation4 + %s843_s26]]  ;;  %s219_s25 = sadd.s32 1, %s843_s26 }
  0x75   : > { %s228_s27 = sadd.s32 2, %s843_s26  ;;  %s220_s21 = sld [smem:[#allocation3 + %s219_s25]] }
  0x76   : > { %s221_s28 = sld [smem:[#allocation4 + %s219_s25]]  ;;  %s237_s6 = sadd.s32 3, %s843_s26 }
  0x77   : > { %s229_s29 = sld [smem:[#allocation3 + %s228_s27]]  ;;  %s246_s7 = sadd.s32 4, %s843_s26 }
  0x78   : > { %s230_s30 = sld [smem:[#allocation4 + %s228_s27]]  ;;  %s862_s13 = scalar_lea.vmem [#allocation10], %s405_s20 }
  0x79   : > { %s238_s12 = sld [smem:[#allocation3 + %s237_s6]]  ;;  %s213_s23 = scalar_lea.vmem [#allocation5], %s211_s17 }
  0x7a   : > { %v214_v0 = vld [vmem:[%s213_s23] sm:$0x1]  ;;  %s215_s2 = scalar_lea.vmem %s948_s3, %s212_s22  ;;  %s239_s4 = sld [smem:[#allocation4 + %s237_s6]] }
  0x7b   : > { %v216_v1 = vld [vmem:[%s215_s2] sm:$0x1]  ;;  %s247_s24 = sld [smem:[#allocation3 + %s246_s7]]  ;;  %s222_s19 = scalar_lea.vmem [#allocation5], %s220_s21 }
  0x7c   : > { %s248_s14 = sld [smem:[#allocation4 + %s246_s7]]  ;;  %v217_v2 = vadd.f32 %v216_v1, %v214_v0  ;;  %s224_s27 = scalar_lea.vmem %s948_s3, %s221_s28  ;;  %v223_v3 = vld [vmem:[%s222_s19] sm:$0x1] }
  0x7d   : > { %v225_v4 = vld [vmem:[%s224_s27] sm:$0x1]  ;;  %s231_s2 = scalar_lea.vmem [#allocation5], %s229_s29  ;;  %s255_s22 = sadd.s32 5, %s843_s26 }
  0x7e   : > { %s233_s8 = scalar_lea.vmem %s948_s3, %s230_s30  ;;  %218 = vst [vmem:[%s862_s13] sm:$0x1] %v217_v2  ;;  %v226_v5 = vadd.f32 %v225_v4, %v223_v3  ;;  %v232_v6 = vld [vmem:[%s231_s2] sm:$0x1]  ;;  %s264_s10 = sadd.s32 6, %s843_s26 }
  0x7f   : > { %v234_v7 = vld [vmem:[%s233_s8] sm:$0x1]  ;;  %s256_s21 = sld [smem:[#allocation3 + %s255_s22]]  ;;  %s240_s19 = scalar_lea.vmem [#allocation5], %s238_s12 }
  0x80   : > { %v235_v8 = vadd.f32 %v234_v7, %v232_v6  ;;  %227 = vst [vmem:[%s862_s13 + $0x1] sm:$0x1] %v226_v5  ;;  %v241_v9 = vld [vmem:[%s240_s19] sm:$0x1]  ;;  %s242_s30 = scalar_lea.vmem %s948_s3, %s239_s4  ;;  %s257_s6 = sld [smem:[#allocation4 + %s255_s22]] }
  0x81   : > { %v243_v10 = vld [vmem:[%s242_s30] sm:$0x1]  ;;  %s249_s15 = scalar_lea.vmem [#allocation5], %s247_s24  ;;  %s265_s25 = sld [smem:[#allocation3 + %s264_s10]] }
  0x82   : > { %236 = vst [vmem:[%s862_s13 + $0x2] sm:$0x1] %v235_v8  ;;  %s251_s8 = scalar_lea.vmem %s948_s3, %s248_s14  ;;  %v244_v11 = vadd.f32 %v243_v10, %v241_v9  ;;  %v250_v12 = vld [vmem:[%s249_s15] sm:$0x1]  ;;  %s266_s27 = sld [smem:[#allocation4 + %s264_s10]] }
  0x83   : > { %v252_v13 = vld [vmem:[%s251_s8] sm:$0x1]  ;;  %s273_s12 = sadd.s32 7, %s843_s26  ;;  %s301_s29 = sshll.u32 %s862_s13, 4  ;;  %s898_s29 = int_to_ptr.vmem [resolvable:$true] %s301_s29 }
  0x84   : > { %v253_v14 = vadd.f32 %v252_v13, %v250_v12  ;;  %245 = vst [vmem:[%s862_s13 + $0x3] sm:$0x1] %v244_v11  ;;  %s274_s17 = sld [smem:[#allocation3 + %s273_s12]]  ;;  %p976_p9 = scmp.ne.s32.totalorder %s965_s16, 0 }
  0x85   : > { %s275_s4 = sld [smem:[#allocation4 + %s273_s12]]  ;;  %s258_s23 = scalar_lea.vmem [#allocation5], %s256_s21 }
  0x86   : > { %254 = vst [vmem:[%s862_s13 + $0x4] sm:$0x1] %v253_v14  ;;  %v259_v15 = vld [vmem:[%s258_s23] sm:$0x1]  ;;  %s260_s14 = scalar_lea.vmem %s948_s3, %s257_s6  ;;  %s408_s6 = sshll.u32 %s649_s9, 7 }
  0x87   : > { %v261_v16 = vld [vmem:[%s260_s14] sm:$0x1]  ;;  %s267_s19 = scalar_lea.vmem [#allocation5], %s265_s25  ;;  %s896_s15 = scalar_lea.hbm %s950_s5, %s408_s6 }
  0x88   : > { %v262_v17 = vadd.f32 %v261_v16, %v259_v15  ;;  %s269_s26 = scalar_lea.vmem %s948_s3, %s266_s27  ;;  %v268_v18 = vld [vmem:[%s267_s19] sm:$0x1]  ;;  %s975_s25 = sand.u32 1, %s641_s1  }
  0x89   : > { %v270_v19 = vld [vmem:[%s269_s26] sm:$0x1]  ;;  %s287_s27 = scalar_lea.sflag [#allocation7], %s975_s25  ;;  %s569_s12 = scalar_lea.vmem %s898_s29, 128 }
  0x8a   : > { %263 = vst [vmem:[%s862_s13 + $0x5] sm:$0x1] %v262_v17  ;;  %v271_v20 = vadd.f32 %v270_v19, %v268_v18  ;;  %s276_s30 = scalar_lea.vmem [#allocation5], %s274_s17  ;;  %p570_p7 = scmp.ne.s32.totalorder %s898_s29, %s569_s12 }
  0x8b   : > { %s278_s20 = scalar_lea.vmem %s948_s3, %s275_s4  ;;  %v277_v21 = vld [vmem:[%s276_s30] sm:$0x1]  ;;  %s665_s9 = smov [#allocation10]  }
  0x8c   : > { %v279_v22 = vld [vmem:[%s278_s20] sm:$0x1]  ;;  %272 = vst [vmem:[%s862_s13 + $0x6] sm:$0x1] %v271_v20  ;;  %p571_p2 = pnand %p570_p7, %p976_p9  ;;  %s573_s17 = sshll.u32 %s665_s9, 4  ;;  %s574_s17 = int_to_ptr.vmem [resolvable:$false] %s573_s17 }
  0x8d   : > { %v280_v23 = vadd.f32 %v279_v22, %v277_v21  ;;  %s575_s4 = scalar_lea.vmem %s574_s17, 256  ;;  %p576_p5 = scmp.lt.s32.totalorder %s898_s29, %s574_s17 }
  0x8e   : > { %p572_p4 = pneg %p571_p2  ;;  %p577_p10 = scmp.lt.s32.totalorder %s575_s4, %s569_s12 }
  0x8f   : > { %281 = vst [vmem:[%s862_s13 + $0x7] sm:$0x1] %v280_v23 }
  0x90   : > { %p578_p11 = por %p577_p10, %p576_p5 }
  0x92   : > { %p579_p13 = pnand %p578_p11, %p572_p4 }
  0x96   : > { %v282_v25 = vld [vmem:[%s862_s13] sm:$0xff] }
  0x97   : > { %v284_v26 = vadd.f32 %v283_v24, %v282_v25 }
  0x99   : > { %285 = vst [vmem:[%s862_s13] sm:$0xff] %v284_v26 }
  0x9a   : > { %582 = shalt.err (!%p579_p13)
}
  0x9b   : > { %s583_s13 = scalar_lea.hbm %s896_s15, 128  ;;  %s587_s22 = scalar_lea.hbm %s950_s5, 256 }
  0x9c   : > { %p584_p0 = scmp.ne.s32.totalorder %s896_s15, %s583_s13  ;;  %p588_p6 = scmp.lt.u32.totalorder %s896_s15, %s950_s5 }
  0x9d   : > { %p589_p8 = scmp.lt.u32.totalorder %s587_s22, %s583_s13  ;;  %p591_p7 = scmp.lt.u32.totalorder %s583_s13, %s896_s15 }
  0x9e   : > { %p585_p1 = pnand %p584_p0, %p976_p9 }
  0x9f   : > { %p590_p12 = por %p589_p8, %p588_p6 }
  0xa0   : > { %p586_p3 = pneg %p585_p1 }
  0xa1   : > { %p592_p2 = por %p591_p7, %p590_p12 }
  0xa3   : > { %p593_p4 = pnand %p592_p2, %p586_p3 }
  0xa5   : > { %596 = shalt.err (!%p593_p4)
}
  0xa6   : > { %419 = dma.vmem_to_hbm [thread:$0]  (%p976_p9), %s898_s29, 128, %s896_s15, %s287_s27  }
  0xa7 PF: > { %p436_p5 = scmp.ge.s32.totalorder %s657_s11, 2  ;;  %s313_s10 = sand.u32 1, %s637_s0  }
  0xa8   : > { %p977_p10 = scmp.ne.s32.totalorder %s966_s18, 0  ;;  %s314_s26 = scalar_lea.sflag [#allocation7], %s313_s10 }
  0xaa   : > { %p429_p11 = pnand %p436_p5, %p977_p10 }
  0xac   : > { %632 = dma.done.wait (!%p429_p11), %s314_s26, 128  }
  0xad   : > { %634 = vsyncadd (!%p429_p11), %s314_s26, 4294967168  ;;  %s28_s11 = sadd.s32 1, %s657_s11   ;;  %s978_s19 = sld [smem:[#allocation15_spill]] }
  0xae   : > { %p25_p13 = scmp.ge.s32.totalorder %s28_s11, 4   ;;  %s979_s8 = sld [smem:[#allocation18_spill]] }
  0xaf   : > { %s980_s9 = sld [smem:[#allocation16_spill]]  ;;  %s981_s10 = sld [smem:[#allocation17_spill]] }
  0xb0   : > { %s982_s0 = smov %s641_s1  ;;  %27 = sbr.rel (!%p25_p13) target bundleno = 29 (0x1d), region = 90 }
  0xb3   : > { %s983_s1 = smov %s978_s19 }
  0xb7   :  { %319 = vsyncpa [#allocation6], 1 }
  0xb8   :  { %321 = vsyncpa [#allocation6 + $0x1], 1 }
  0xb9   :  { %322 = vsyncpa [#allocation9], 1 }
  0xba   :  { %323 = vsyncpa [#allocation7], 1 }
  0xbb   :  { %325 = vsyncpa [#allocation7 + $0x1], 1 }

</bundles_post_ra>
